<compile_context>
chip_gen: v7x
topology: tpu7x:2x2x1
jax: 0.10.0
libtpu: 0.0.40
codegen_flags: <defaults>
</compile_context>

<pallas_src>
import jax
import jax.numpy as jnp
from jax.experimental import pallas as pl
from jax.experimental.pallas import tpu as pltpu

IN_FEATURES = 28 * 28      # 784
HIDDEN = 128
NUM_CLASSES = 10
PADDED_CLASSES = 128       # lane-dense output / MXU N dim
DEFAULT_TILE_BATCH = 1024  # f32 x tile: 1024x784x4 = 3.1 MiB; double-buffered
                           # plus out/weights ~ 8.5 MiB total -> fits default
                           # scoped VMEM on v5e/v6e/v7x.


def _round_up(x, m):
    return ((x + m - 1) // m) * m


def mlp_kernel(x_ref, w1_ref, b1_ref, w2_ref, b2_ref, out_ref):
    """Fused (x @ W1 + b1) -> ReLU -> (h @ W2p + b2p) on one batch tile.

    x_ref  : (TB, 784) f32  VMEM  (pipelined over the batch grid axis)
    w1_ref : (784, 128) bf16 VMEM (resident)
    b1_ref : (1, 128)   f32  VMEM (resident)
    w2_ref : (128, 128) f32  VMEM (resident, zero-padded from (128,10))
    b2_ref : (1, 128)   f32  VMEM (resident, zero-padded from (10,))
    out_ref: (TB, 128)  f32  VMEM (lane-dense; wrapper slices [:, :10])
    """
    # Cast the activation tile to bf16 in-register (VPU, hidden under DMA),
    # then Linear(784 -> 128) on the MXU with f32 accumulation.
    x_bf16 = x_ref[...].astype(jnp.bfloat16)
    h = jnp.dot(x_bf16, w1_ref[...], preferred_element_type=jnp.float32)
    # Bias + ReLU in f32 on the VPU.
    h = jnp.maximum(h + b1_ref[...], 0.0)
    # Dropout(0.2): identity in eval mode.
    # Linear(128 -> 10), computed on a padded 128-wide N dim.
    out_ref[...] = (
        jnp.dot(h, w2_ref[...], preferred_element_type=jnp.float32) + b2_ref[...]
    )


def mnist_classifier_forward(x_nchw, w1, b1, w2, b2, *, tile_batch=DEFAULT_TILE_BATCH):
    """x_nchw: (N, 1, 28, 28) float32 -> logits (N, 10) float32.

    Weights stored as (in_features, out_features) (transpose of torch layout),
    so the kernel computes plain x @ W + b.
    """
    n = x_nchw.shape[0]
    x_flat = x_nchw.reshape(n, -1)                      # torch.nn.Flatten (free reshape)

    # Resident weights: W1 as bf16 (one-time tiny conversion), biases f32,
    # W2/b2 zero-padded out to a lane-dense 128-wide N dim (tiny, one-time).
    w1_bf16 = w1.astype(jnp.bfloat16)
    b1_2d = b1.reshape(1, HIDDEN).astype(jnp.float32)
    w2_p = jnp.pad(w2.astype(jnp.float32),
                   ((0, 0), (0, PADDED_CLASSES - NUM_CLASSES)))
    b2_p = jnp.pad(b2.reshape(1, NUM_CLASSES).astype(jnp.float32),
                   ((0, 0), (0, PADDED_CLASSES - NUM_CLASSES)))

    # Batch tiling: block rows must be a multiple of 8 (sublane); ragged last
    # block (when tb does not divide n) is handled by Pallas boundary masking,
    # so x is never copied/padded in the wrapper.
    tb = min(tile_batch, _round_up(n, 8))
    tb = max(8, (tb // 8) * 8)
    grid = (pl.cdiv(n, tb),)

    logits_padded = pl.pallas_call(
        mlp_kernel,
        out_shape=jax.ShapeDtypeStruct((n, PADDED_CLASSES), jnp.float32),
        grid_spec=pltpu.PrefetchScalarGridSpec(
            num_scalar_prefetch=0,
            grid=grid,
            in_specs=[
                # x: one batch tile per grid step (pipelined, f32 from HBM).
                pl.BlockSpec((tb, IN_FEATURES), lambda i: (i, 0)),
                # Weights / biases: same block every step -> stay resident.
                pl.BlockSpec((IN_FEATURES, HIDDEN), lambda i: (0, 0)),
                pl.BlockSpec((1, HIDDEN), lambda i: (0, 0)),
                pl.BlockSpec((HIDDEN, PADDED_CLASSES), lambda i: (0, 0)),
                pl.BlockSpec((1, PADDED_CLASSES), lambda i: (0, 0)),
            ],
            out_specs=pl.BlockSpec((tb, PADDED_CLASSES), lambda i: (i, 0)),
        ),
        compiler_params=pltpu.CompilerParams(
            # Batch tiles are independent -> shard across TensorCores (v7x).
            dimension_semantics=("parallel",),
        ),
    )(x_flat, w1_bf16, b1_2d, w2_p, b2_p)

    return logits_padded[:, :NUM_CLASSES]


def init_params(key):
    """Deterministic init matching the torch Linear shapes (stored transposed)."""
    k1, k2, k3, k4 = jax.random.split(key, 4)
    # torch default init: U(-1/sqrt(fan_in), 1/sqrt(fan_in))
    lim1 = 1.0 / (IN_FEATURES ** 0.5)
    lim2 = 1.0 / (HIDDEN ** 0.5)
    w1 = jax.random.uniform(k1, (IN_FEATURES, HIDDEN), jnp.float32, -lim1, lim1)
    b1 = jax.random.uniform(k2, (HIDDEN,), jnp.float32, -lim1, lim1)
    w2 = jax.random.uniform(k3, (HIDDEN, NUM_CLASSES), jnp.float32, -lim2, lim2)
    b2 = jax.random.uniform(k4, (NUM_CLASSES,), jnp.float32, -lim2, lim2)
    return w1, b1, w2, b2


if __name__ == "__main__":
    key = jax.random.PRNGKey(0)
    k_x, k_p = jax.random.split(key)

    batch = 8
    x = jax.random.normal(k_x, (batch, 1, 28, 28), jnp.float32)  # NCHW like MNIST
    w1, b1, w2, b2 = init_params(k_p)

    logits = mnist_classifier_forward(x, w1, b1, w2, b2)
    logits = jax.block_until_ready(logits)
    assert logits.shape == (batch, NUM_CLASSES)

    # Pure-JAX reference with the same bf16 quantization of the x/W1 stream
    # (eval-mode dropout = identity), f32 everywhere else.
    x_flat = x.reshape(batch, -1)
    xq = x_flat.astype(jnp.bfloat16).astype(jnp.float32)
    w1q = w1.astype(jnp.bfloat16).astype(jnp.float32)
    ref = jnp.maximum(xq @ w1q + b1, 0.0) @ w2 + b2
    assert jnp.allclose(logits, ref, atol=1e-2, rtol=1e-2), (
        float(jnp.max(jnp.abs(logits - ref)))
    )

    print("KERNEL_OK")
</pallas_src>

<mosaic_0001>
module attributes {stable_mosaic.version = 11 : i64} {
  func.func @mlp_kernel(%arg0: i32, %arg1: memref<8x784xf32, #tpu.memory_space<vmem>>, %arg2: memref<784x128xbf16, #tpu.memory_space<vmem>>, %arg3: memref<1x128xf32, #tpu.memory_space<vmem>>, %arg4: memref<128x128xf32, #tpu.memory_space<vmem>>, %arg5: memref<1x128xf32, #tpu.memory_space<vmem>>, %arg6: memref<8x128xf32, #tpu.memory_space<vmem>>) attributes {dimension_semantics = [#tpu.dimension_semantics<parallel>], iteration_bounds = array<i64: 1>, scalar_prefetch = 0 : i64, scratch_operands = 0 : i64, tpu.core_type = #tpu.core_type<tc>, window_params = [{transform_indices = @transform_0, window_bounds = array<i64: 8, 784>}, {pipeline_mode = #tpu.pipeline_mode<synchronous>, transform_indices = @transform_1, window_bounds = array<i64: 784, 128>}, {pipeline_mode = #tpu.pipeline_mode<synchronous>, transform_indices = @transform_2, window_bounds = array<i64: 1, 128>}, {pipeline_mode = #tpu.pipeline_mode<synchronous>, transform_indices = @transform_3, window_bounds = array<i64: 128, 128>}, {pipeline_mode = #tpu.pipeline_mode<synchronous>, transform_indices = @transform_4, window_bounds = array<i64: 1, 128>}, {transform_indices = @transform_5, window_bounds = array<i64: 8, 128>}]} {
    %c0 = arith.constant 0 : index
    %c0_0 = arith.constant 0 : index
    %0 = vector.load %arg1[%c0, %c0_0] : memref<8x784xf32, #tpu.memory_space<vmem>>, vector<8x784xf32>
    %1 = arith.truncf %0 : vector<8x784xf32> to vector<8x784xbf16>
    %c0_1 = arith.constant 0 : index
    %c0_2 = arith.constant 0 : index
    %2 = vector.load %arg2[%c0_1, %c0_2] : memref<784x128xbf16, #tpu.memory_space<vmem>>, vector<784x128xbf16>
    %cst = arith.constant dense<0.000000e+00> : vector<8x128xf32>
    %3 = tpu.matmul %1, %2, %cst {dimension_numbers = #tpu.dot_dimension_numbers<[1], [0], [0], [1], [0, 0, 1, 1], [], []>} : vector<8x784xbf16>, vector<784x128xbf16>, vector<8x128xf32> -> vector<8x128xf32>
    %c0_3 = arith.constant 0 : index
    %c0_4 = arith.constant 0 : index
    %4 = vector.load %arg3[%c0_3, %c0_4] : memref<1x128xf32, #tpu.memory_space<vmem>>, vector<1x128xf32>
    %5 = vector.broadcast %4 : vector<1x128xf32> to vector<8x128xf32>
    %6 = arith.addf %3, %5 : vector<8x128xf32>
    %cst_5 = arith.constant 0.000000e+00 : f32
    %7 = vector.broadcast %cst_5 : f32 to vector<8x128xf32>
    %8 = arith.maximumf %6, %7 : vector<8x128xf32>
    %c0_6 = arith.constant 0 : index
    %c0_7 = arith.constant 0 : index
    %9 = vector.load %arg4[%c0_6, %c0_7] : memref<128x128xf32, #tpu.memory_space<vmem>>, vector<128x128xf32>
    %cst_8 = arith.constant dense<0.000000e+00> : vector<8x128xf32>
    %10 = tpu.matmul %8, %9, %cst_8 {dimension_numbers = #tpu.dot_dimension_numbers<[1], [0], [0], [1], [0, 0, 1, 1], [], []>} : vector<8x128xf32>, vector<128x128xf32>, vector<8x128xf32> -> vector<8x128xf32>
    %c0_9 = arith.constant 0 : index
    %c0_10 = arith.constant 0 : index
    %11 = vector.load %arg5[%c0_9, %c0_10] : memref<1x128xf32, #tpu.memory_space<vmem>>, vector<1x128xf32>
    %12 = vector.broadcast %11 : vector<1x128xf32> to vector<8x128xf32>
    %13 = arith.addf %10, %12 : vector<8x128xf32>
    %c0_11 = arith.constant 0 : index
    %c0_12 = arith.constant 0 : index
    %14 = vector.load %arg6[%c0_11, %c0_12] : memref<8x128xf32, #tpu.memory_space<vmem>>, vector<8x128xf32>
    tpu.vector_store %arg6[%c0_11, %c0_12], %13 {strides = array<i32>} : memref<8x128xf32, #tpu.memory_space<vmem>>, vector<8x128xf32>,
    return
  }
  func.func @transform_0(%arg0: i32) -> (i32, i32) {
    %c0_i32 = arith.constant 0 : i32
    %c0_i32_0 = arith.constant 0 : i32
    return %arg0, %c0_i32 : i32, i32
  }
  func.func @transform_1(%arg0: i32) -> (i32, i32) {
    %c0_i32 = arith.constant 0 : i32
    %c0_i32_0 = arith.constant 0 : i32
    %c0_i32_1 = arith.constant 0 : i32
    return %c0_i32, %c0_i32_0 : i32, i32
  }
  func.func @transform_2(%arg0: i32) -> (i32, i32) {
    %c0_i32 = arith.constant 0 : i32
    %c0_i32_0 = arith.constant 0 : i32
    %c0_i32_1 = arith.constant 0 : i32
    return %c0_i32, %c0_i32_0 : i32, i32
  }
  func.func @transform_3(%arg0: i32) -> (i32, i32) {
    %c0_i32 = arith.constant 0 : i32
    %c0_i32_0 = arith.constant 0 : i32
    %c0_i32_1 = arith.constant 0 : i32
    return %c0_i32, %c0_i32_0 : i32, i32
  }
  func.func @transform_4(%arg0: i32) -> (i32, i32) {
    %c0_i32 = arith.constant 0 : i32
    %c0_i32_0 = arith.constant 0 : i32
    %c0_i32_1 = arith.constant 0 : i32
    return %c0_i32, %c0_i32_0 : i32, i32
  }
  func.func @transform_5(%arg0: i32) -> (i32, i32) {
    %c0_i32 = arith.constant 0 : i32
    %c0_i32_0 = arith.constant 0 : i32
    return %arg0, %c0_i32 : i32, i32
  }
}

</mosaic_0001>

<bundles_post_ra>
// kernel: tpu_custom_call.1
= control target key start
LH: loop header
LB: loop body
LE: loop exit
PB: predicated region body
PF: predicated region fallthrough
CT: control target
= control target key end

     0   :  { %10 = vsyncpa [#allocation3], 0  ;;  %s1202_s0 = inlined_call_operand.hbm [shape: f32[8,784], index: 0, kind: input, shape index: {}]   ;;  %s1203_s1 = inlined_call_operand.hbm [shape: bf16[784,128], index: 1, kind: input, shape index: {}]   ;;  %s1204_s2 = inlined_call_operand.vmem [shape: f32[1,128], index: 2, kind: input, shape index: {}]   ;;  %s1205_s3 = inlined_call_operand.hbm [shape: f32[128,128], index: 3, kind: input, shape index: {}]   ;;  %s1206_s4 = inlined_call_operand.vmem [shape: f32[1,128], index: 4, kind: input, shape index: {}]   ;;  %s1207_s5 = inlined_call_operand.hbm [shape: f32[8,128], index: 5, kind: output, shape index: {}]  }
   0x1   :  { %11 = vsyncpa [#allocation6], 0 }
   0x2   :  { %12 = vsyncpa [#allocation4], 0  ;;  %s1105_s18 = smov [#allocation5]   ;;  %s1011_s22 = scalar_lea.hbm %s1203_s1, 6272 }
   0x3   :  { %s28_s19 = sshll.u32 %s1105_s18, 4  ;;  %p1012_p0 = scmp.ne.s32.totalorder %s1203_s1, %s1011_s22  ;;  %s29_s19 = int_to_ptr.vmem [resolvable:$true] %s28_s19 }
   0x4   :  { %p1015_p1 = scmp.lt.u32.totalorder %s1011_s22, %s1203_s1 }
   0x6   :  { %p1017_p2 = pnand %p1015_p1, %p1012_p0 }
   0x8   :  { %1020 = shalt.err (!%p1017_p2)
}
   0x9   :  { %s1021_s27 = scalar_lea.vmem %s29_s19, 6272  ;;  %p1026_p4 = scmp.lt.s32.totalorder %s29_s19, %s29_s19 }
   0xa   :  { %p1022_p3 = scmp.ne.s32.totalorder %s29_s19, %s1021_s27  ;;  %p1027_p5 = scmp.lt.s32.totalorder %s1021_s27, %s1021_s27 }
   0xc   :  { %p1028_p6 = por %p1027_p5, %p1026_p4 }
   0xe   :  { %p1029_p7 = pnand %p1028_p6, %p1022_p3 }
  0x10   :  { %1032 = shalt.err (!%p1029_p7)
}
  0x11   :  { %s1106_s28 = smov 64   ;;  %s1107_s29 = smov 4  }
  0x12   :  { %34 = dma.hbm_to_vmem [thread:$0]  %s1203_s1, 6272, %s29_s19, [#allocation6], %s1106_s28, %s1106_s28, %s1107_s29  }
  0x13   :  { %s1108_s7 = smov [#allocation2]   ;;  %s1109_s9 = smov [#allocation7]  }
  0x14   :  { %s19_s8 = sshll.u32 %s1108_s7, 4  ;;  %s42_s10 = sshll.u32 %s1109_s9, 4  ;;  %s20_s8 = int_to_ptr.vmem [resolvable:$true] %s19_s8  ;;  %s43_s10 = int_to_ptr.vmem [resolvable:$true] %s42_s10 }
  0x15   :  { %s1033_s13 = scalar_lea.hbm %s1202_s0, 896 }
  0x16   :  { %p1034_p8 = scmp.ne.s32.totalorder %s1202_s0, %s1033_s13  ;;  %p1037_p9 = scmp.lt.u32.totalorder %s1033_s13, %s1202_s0 }
  0x18   :  { %p1039_p10 = pnand %p1037_p9, %p1034_p8 }
  0x1a   :  { %1042 = shalt.err (!%p1039_p10)
}
  0x1b   :  { %s1043_s1 = scalar_lea.vmem %s20_s8, 896  ;;  %p1048_p12 = scmp.lt.s32.totalorder %s20_s8, %s20_s8 }
  0x1c   :  { %p1044_p11 = scmp.ne.s32.totalorder %s20_s8, %s1043_s1  ;;  %p1049_p13 = scmp.lt.s32.totalorder %s1043_s1, %s1043_s1 }
  0x1e   :  { %p1050_p0 = por %p1049_p13, %p1048_p12 }
  0x20   :  { %p1051_p1 = pnand %p1050_p0, %p1044_p11 }
  0x22   :  { %1054 = shalt.err (!%p1051_p1)
}
  0x23   :  { %22 = dma.hbm_to_vmem [thread:$0]  %s1202_s0, 896, %s20_s8, [#allocation3]  }
  0x24   :  { %s1055_s22 = scalar_lea.hbm %s1205_s3, 2048 }
  0x25   :  { %p1056_p2 = scmp.ne.s32.totalorder %s1205_s3, %s1055_s22  ;;  %p1059_p3 = scmp.lt.u32.totalorder %s1055_s22, %s1205_s3 }
  0x27   :  { %p1061_p4 = pnand %p1059_p3, %p1056_p2 }
  0x29   :  { %1064 = shalt.err (!%p1061_p4)
}
  0x2a   :  { %s1065_s27 = scalar_lea.vmem %s43_s10, 2048  ;;  %p1070_p6 = scmp.lt.s32.totalorder %s43_s10, %s43_s10 }
  0x2b   :  { %p1066_p5 = scmp.ne.s32.totalorder %s43_s10, %s1065_s27  ;;  %p1071_p7 = scmp.lt.s32.totalorder %s1065_s27, %s1065_s27 }
  0x2d   :  { %p1072_p8 = por %p1071_p7, %p1070_p6 }
  0x2f   :  { %p1073_p9 = pnand %p1072_p8, %p1066_p5 }
  0x31   :  { %1076 = shalt.err (!%p1073_p9)
}
  0x32   :  { %s1110_s0 = smov 128   ;;  %s1111_s28 = smov 8  }
  0x33   :  { %48 = dma.hbm_to_vmem [thread:$0]  %s1205_s3, 2048, %s43_s10, [#allocation6], %s1110_s0, %s1110_s0, %s1111_s28  }
  0x34   :  { %1099 = dma.done.wait [#allocation3], 896  }
  0x35   :  { %1100 = vsyncadd [#allocation3], 4294966400 }
  0x36   :  { %1101 = dma.done.wait [#allocation6], 8320  }
  0x37   :  { %1102 = vsyncadd [#allocation6], 4294958976  ;;  %v962_v0 = vld [vmem:[#allocation5 + $0x40] sm:$0xff]   ;;  %v966_v4 = vld [vmem:[#allocation5 + $0x48] sm:$0xff]   ;;  %v1112_v44 = vmov 0.0   ;;  %vm1113_vm0 = vmmov 0  }
  0x38   :  { %v963_v1 = vld [vmem:[#allocation5] sm:$0xff]   ;;  %801 = vmatprep.subr.bf16.mxu0 %v962_v0  ;;  %v967_v5 = vld [vmem:[#allocation5 + $0x8] sm:$0xff]   ;;  %v970_v8 = vld [vmem:[#allocation5 + $0x50] sm:$0xff]   ;;  %vm474_vm1 = vcmask 130048   ;;  %s1115_s8 = smov [#allocation8]  }
  0x39   :  { %v964_v2 = vld [vmem:[#allocation5 + $0xc0] sm:$0xff]   ;;  %802 = vmatpush3.bf16.msra.mxu0 %v963_v1  ;;  %v968_v6 = vld [vmem:[#allocation5 + $0xc8] sm:$0xff]   ;;  %v971_v9 = vld [vmem:[#allocation5 + $0x10] sm:$0xff]   ;;  %s739_s9 = sshll.u32 %s1115_s8, 4  ;;  %s740_s9 = int_to_ptr.vmem [resolvable:$true] %s739_s9 }
  0x3a   :  { %v965_v3 = vld [vmem:[#allocation5 + $0x80] sm:$0xff]   ;;  %823 = vmatprep.subr.bf16.mxu1 %v964_v2  ;;  %803 = vmatprep.subr.bf16.mxu0 %v966_v4  ;;  %v969_v7 = vld [vmem:[#allocation5 + $0x88] sm:$0xff]   ;;  %v972_v10 = vld [vmem:[#allocation5 + $0xd0] sm:$0xff]   ;;  %s1077_s10 = scalar_lea.vmem %s740_s9, 128  ;;  %p1082_p11 = scmp.lt.s32.totalorder %s740_s9, %s740_s9 }
  0x3b   :  { %824 = vmatpush3.bf16.msra.mxu1 %v965_v3  ;;  %v973_v11 = vld [vmem:[#allocation5 + $0x90] sm:$0xff]   ;;  %v974_v12 = vld [vmem:[#allocation5 + $0x58] sm:$0xff]   ;;  %v978_v16 = vld [vmem:[#allocation5 + $0x60] sm:$0xff]   ;;  %v1114_v3 = vmov 0.0|0.0   ;;  %p1078_p10 = scmp.ne.s32.totalorder %s740_s9, %s1077_s10  ;;  %p1083_p12 = scmp.lt.s32.totalorder %s1077_s10, %s1077_s10 }
  0x3c   :  { %825 = vmatprep.subr.bf16.mxu1 %v968_v6  ;;  %v975_v13 = vld [vmem:[#allocation5 + $0x18] sm:$0xff]   ;;  %v979_v17 = vld [vmem:[#allocation5 + $0x20] sm:$0xff]   ;;  %v982_v20 = vld [vmem:[#allocation5 + $0x68] sm:$0xff]  }
  0x3d   :  { %804 = vmatpush3.bf16.msra.mxu0 %v967_v5  ;;  %v976_v14 = vld [vmem:[#allocation5 + $0xd8] sm:$0xff]   ;;  %v980_v18 = vld [vmem:[#allocation5 + $0xe0] sm:$0xff]   ;;  %v983_v21 = vld [vmem:[#allocation5 + $0x28] sm:$0xff]   ;;  %p1084_p13 = por %p1083_p12, %p1082_p11 }
  0x3e   :  { %805 = vmatprep.subr.bf16.mxu0 %v970_v8  ;;  %v977_v15 = vld [vmem:[#allocation5 + $0x98] sm:$0xff]   ;;  %v981_v19 = vld [vmem:[#allocation5 + $0xa0] sm:$0xff]   ;;  %v984_v22 = vld [vmem:[#allocation5 + $0xe8] sm:$0xff]  }
  0x3f   :  { %826 = vmatpush3.bf16.msra.mxu1 %v969_v7  ;;  %v985_v23 = vld [vmem:[#allocation5 + $0xa8] sm:$0xff]   ;;  %v986_v24 = vld [vmem:[#allocation5 + $0x70] sm:$0xff]   ;;  %v990_v28 = vld [vmem:[#allocation5 + $0x78] sm:$0xff]   ;;  %p1085_p0 = pnand %p1084_p13, %p1078_p10 }
  0x40   :  { %827 = vmatprep.subr.bf16.mxu1 %v972_v10  ;;  %v987_v25 = vld [vmem:[#allocation5 + $0x30] sm:$0xff]   ;;  %v991_v29 = vld [vmem:[#allocation5 + $0x38] sm:$0xff]   ;;  %v61_v34 = vld [vmem:[#allocation2] sm:$0xff] }
  0x41   :  { %806 = vmatpush3.bf16.msra.mxu0 %v971_v9  ;;  %v988_v26 = vld [vmem:[#allocation5 + $0xf0] sm:$0xff]   ;;  %v992_v30 = vld [vmem:[#allocation5 + $0xf8] sm:$0xff]   ;;  %v68_v35 = vpack.c.bf16 %v61_v34, %v61_v34  ;;  %v994_v36 = vld [vmem:[#allocation5 + $0x140] sm:$0xff]  }
  0x42   :  { %807 = vmatprep.subr.bf16.mxu0 %v974_v12  ;;  %v989_v27 = vld [vmem:[#allocation5 + $0xb0] sm:$0xff]   ;;  %v993_v33 = vld [vmem:[#allocation5 + $0xb8] sm:$0xff]   ;;  %v64_v37 = vld [vmem:[#allocation2 + $0x18] sm:$0xff] }
  0x43   :  { %828 = vmatpush3.bf16.msra.mxu1 %v973_v11  ;;  %v62_v31 = vld [vmem:[#allocation2 + $0x8] sm:$0xff]  ;;  %v71_v38 = vpack.c.bf16 %v64_v37, %v64_v37  ;;  %v995_v39 = vld [vmem:[#allocation5 + $0x100] sm:$0xff]   ;;  %v63_v40 = vld [vmem:[#allocation2 + $0x10] sm:$0xff] }
  0x44   :  { %829 = vmatprep.subr.bf16.mxu1 %v976_v14  ;;  %v69_v32 = vpack.c.bf16 %v62_v31, %v62_v31  ;;  %v70_v41 = vpack.c.bf16 %v63_v40, %v63_v40  ;;  %v996_v42 = vld [vmem:[#allocation5 + $0x148] sm:$0xff]   ;;  %v998_v45 = vld [vmem:[#allocation5 + $0x150] sm:$0xff]   ;;  %v1000_v47 = vld [vmem:[#allocation5 + $0x158] sm:$0xff]  }
  0x45   :  { %808 = vmatpush3.bf16.msra.mxu0 %v975_v13  ;;  %550 = vmatprep.mubr.bf16.mxu1 %v71_v38  ;;  %v997_v43 = vld [vmem:[#allocation5 + $0x108] sm:$0xff]   ;;  %v999_v46 = vld [vmem:[#allocation5 + $0x110] sm:$0xff]   ;;  %v1001_v48 = vld [vmem:[#allocation5 + $0x118] sm:$0xff]  }
  0x46   :  { %809 = vmatprep.subr.bf16.mxu0 %v978_v16  ;;  %510 = vmatprep.mubr.bf16.mxu0 %v69_v32  ;;  %v1002_v49 = vld [vmem:[#allocation5 + $0x160] sm:$0xff]   ;;  %v1004_v51 = vld [vmem:[#allocation5 + $0x168] sm:$0xff]   ;;  %v66_v53 = vld [vmem:[#allocation2 + $0x28] sm:$0xff] }
  0x47   :  { %830 = vmatpush3.bf16.msra.mxu1 %v977_v15  ;;  %v1003_v50 = vld [vmem:[#allocation5 + $0x120] sm:$0xff]   ;;  %v73_v54 = vpack.c.bf16 %v66_v53, %v66_v53  ;;  %v67_v55 = vld [vmem:[#allocation2 + $0x30] sm:$0xff]  ;;  %v1005_v56 = vld [vmem:[#allocation5 + $0x128] sm:$0xff]  }
  0x48   :  { %831 = vmatprep.subr.bf16.mxu1 %v980_v18  ;;  %v1010_v52 = vld [vmem:[#allocation5 + $0x180] sm:$0xff]   ;;  %v74_v57 = vpack.c.bf16 %v67_v55, %v67_v55  ;;  %v1006_v58 = vld [vmem:[#allocation5 + $0x170] sm:$0xff]   ;;  %v1008_v60 = vld [vmem:[#allocation5 + $0x178] sm:$0xff]  }
  0x49   :  { %810 = vmatpush3.bf16.msra.mxu0 %v979_v17  ;;  %v1007_v59 = vld [vmem:[#allocation5 + $0x130] sm:$0xff]   ;;  %v1009_v61 = vld [vmem:[#allocation5 + $0x138] sm:$0xff]   ;;  %v65_v62 = vld [vmem:[#allocation2 + $0x20] sm:$0xff] }
  0x4a   :  { %811 = vmatprep.subr.bf16.mxu0 %v982_v20  ;;  %v72_v63 = vpack.c.bf16 %v65_v62, %v65_v62  ;;  %v639_v0 = vld [vmem:[#allocation7] sm:$0xff]  ;;  %v640_v1 = vld [vmem:[#allocation7 + $0x8] sm:$0xff]  ;;  %v641_v2 = vld [vmem:[#allocation7 + $0x10] sm:$0xff] }
  0x4b   :  { %832 = vmatpush3.bf16.msra.mxu1 %v981_v19  ;;  %v928_v4 = vpack.c.bf16 %v640_v1, %v639_v0  ;;  %v642_v5 = vld [vmem:[#allocation7 + $0x18] sm:$0xff]  ;;  %v643_v7 = vld [vmem:[#allocation7 + $0x20] sm:$0xff]  ;;  %v644_v8 = vld [vmem:[#allocation7 + $0x28] sm:$0xff] }
  0x4c   :  { %833 = vmatprep.subr.bf16.mxu1 %v984_v22  ;;  %v931_v6 = vpack.c.bf16 %v642_v5, %v641_v2  ;;  %v934_v9 = vpack.c.bf16 %v644_v8, %v643_v7  ;;  %v645_v10 = vld [vmem:[#allocation7 + $0x30] sm:$0xff]  ;;  %v646_v11 = vld [vmem:[#allocation7 + $0x38] sm:$0xff]  ;;  %v647_v13 = vld [vmem:[#allocation7 + $0x40] sm:$0xff] }
  0x4d   :  { %812 = vmatpush3.bf16.msra.mxu0 %v983_v21  ;;  %v937_v12 = vpack.c.bf16 %v646_v11, %v645_v10  ;;  %v648_v14 = vld [vmem:[#allocation7 + $0x48] sm:$0xff]  ;;  %v649_v16 = vld [vmem:[#allocation7 + $0x50] sm:$0xff]  ;;  %v650_v17 = vld [vmem:[#allocation7 + $0x58] sm:$0xff] }
  0x4e   :  { %813 = vmatprep.subr.bf16.mxu0 %v986_v24  ;;  %v940_v15 = vpack.c.bf16 %v648_v14, %v647_v13  ;;  %v943_v18 = vpack.c.bf16 %v650_v17, %v649_v16  ;;  %v651_v19 = vld [vmem:[#allocation7 + $0x60] sm:$0xff]  ;;  %v652_v20 = vld [vmem:[#allocation7 + $0x68] sm:$0xff]  ;;  %v653_v22 = vld [vmem:[#allocation7 + $0x70] sm:$0xff] }
  0x4f   :  { %834 = vmatpush3.bf16.msra.mxu1 %v985_v23  ;;  %v946_v21 = vpack.c.bf16 %v652_v20, %v651_v19  ;;  %v654_v23 = vld [vmem:[#allocation7 + $0x78] sm:$0xff] }
  0x50   :  { %835 = vmatprep.subr.bf16.mxu1 %v988_v26  ;;  %v949_v24 = vpack.c.bf16 %v654_v23, %v653_v22  ;;  %v749_v26 = vld [vmem:[%s1204_s2] ss:$0 sm:$0xff] }
  0x51   :  { %814 = vmatpush3.bf16.msra.mxu0 %v987_v25 }
  0x52   :  { %815 = vmatprep.subr.bf16.mxu0 %v990_v28 }
  0x53   :  { %836 = vmatpush3.bf16.msra.mxu1 %v989_v27 }
  0x54   :  { %837 = vmatprep.subr.bf16.mxu1 %v992_v30 }
  0x55   :  { %816 = vmatpush3.bf16.msra.mxu0 %v991_v29 }
  0x56   :  { %845 = vmatprep.subr.bf16.mxu0 %v994_v36 }
  0x57   :  { %838 = vmatpush3.bf16.msra.mxu1 %v993_v33 }
  0x58   :  { %511 = vmatmul.mubr.bf16.vlgmr.msra.gmra.mrb[0].mxu0 %v68_v35  ;;  %886 = vmatprep.subr.bf16.mxu1 %v1112_v44 }
  0x59   :  { %846 = vmatpush3.bf16.msra.mxu0 %v995_v39  ;;  %590 = vmatprep.mubr.bf16.mxu0 %v73_v54 }
  0x5a   :  { %551 = vmatmul.mubr.bf16.vlgmr.msra.gmra.mrb[0].mxu1 %v70_v41  ;;  %847 = vmatprep.subr.bf16.mxu0 %v996_v42 }
  0x5b   :  { %888 = vmatprep.mubr.msk.bf16.mxu1 %vm1113_vm0, %v1112_v44  ;;  %887 = vmatpush3.bf16.msra.mxu1 %v1010_v52 }
  0x5c   :  { %927 = vmatprep.subr.bf16.mxu1 %v1114_v3 }
  0x5d   :  { %848 = vmatpush3.bf16.msra.mxu0 %v997_v43 }
  0x5e   :  { %849 = vmatprep.subr.bf16.mxu0 %v998_v45 }
  0x61   :  { %850 = vmatpush3.bf16.msra.mxu0 %v999_v46 }
  0x62   :  { %851 = vmatprep.subr.bf16.mxu0 %v1000_v47  ;;  %889 = vmatmul.mubr.msk.bf16.vlgmr.msra.gmra.mrb[4].mxu1 %vm474_vm1, %v74_v57 }
  0x63   :  { %924 = vmatprep.mubr.msk.f32.mxu1 %vm1113_vm0, %v1112_v44  ;;  %929 = vmatpush3.bf16.msra.mxu1 %v928_v4 }
  0x64   :  { %930 = vmatprep.subr.bf16.mxu1 %v1114_v3 }
  0x65   :  { %852 = vmatpush3.bf16.msra.mxu0 %v1001_v48 }
  0x66   :  { %853 = vmatprep.subr.bf16.mxu0 %v1002_v49 }
  0x67   :  { %932 = vmatpush3.bf16.msra.mxu1 %v931_v6 }
  0x68   :  { %933 = vmatprep.subr.bf16.mxu1 %v1114_v3 }
  0x69   :  { %854 = vmatpush3.bf16.msra.mxu0 %v1003_v50  ;;  %v800_v50 = vld [vmem:[%s1206_s4] ss:$0 sm:$0xff] }
  0x6a   :  { %855 = vmatprep.subr.bf16.mxu0 %v1004_v51 }
  0x6b   :  { %935 = vmatpush3.bf16.msra.mxu1 %v934_v9 }
  0x6c   :  { %936 = vmatprep.subr.bf16.mxu1 %v1114_v3 }
  0x6d   :  { %856 = vmatpush3.bf16.msra.mxu0 %v1005_v56 }
  0x6e   :  { %857 = vmatprep.subr.bf16.mxu0 %v1006_v58 }
  0x6f   :  { %938 = vmatpush3.bf16.msra.mxu1 %v937_v12 }
  0x70   :  { %939 = vmatprep.subr.bf16.mxu1 %v1114_v3 }
  0x71   :  { %858 = vmatpush3.bf16.msra.mxu0 %v1007_v59 }
  0x72   :  { %859 = vmatprep.subr.bf16.mxu0 %v1008_v60 }
  0x73   :  { %941 = vmatpush3.bf16.msra.mxu1 %v940_v15 }
  0x74   :  { %942 = vmatprep.subr.bf16.mxu1 %v1114_v3 }
  0x75   :  { %860 = vmatpush3.bf16.msra.mxu0 %v1009_v61 }
  0x77   :  { %944 = vmatpush3.bf16.msra.mxu1 %v943_v18 }
  0x78   :  { %591 = vmatmul.mubr.bf16.vlgmr.msra.gmra.mrb[4].mxu0 %v72_v63  ;;  %945 = vmatprep.subr.bf16.mxu1 %v1114_v3 }
  0x7b   :  { %947 = vmatpush3.bf16.msra.mxu1 %v946_v21 }
  0x7c   :  { %948 = vmatprep.subr.bf16.mxu1 %v1114_v3 }
  0x7f   :  { %950 = vmatpush3.bf16.msra.mxu1 %v949_v24 }
 0x12b   :  { %v817_v25 = vpop.f32.mrb[0].mxu0 }
 0x12c   :  { %v818_v27 = vpop.f32.mrb[1].mxu0 }
 0x12d   :  { %v819_v28 = vadd.f32 %v818_v27, %v817_v25  ;;  %v820_v29 = vpop.f32.mrb[2].mxu0  ;;  %v839_v30 = vpop.f32.mrb[0].mxu1 }
 0x12e   :  { %v821_v31 = vpop.f32.mrb[3].mxu0  ;;  %v840_v33 = vpop.f32.mrb[1].mxu1 }
 0x12f   :  { %v513_v32 = vadd.f32 %v819_v28, %v749_v26  ;;  %v841_v34 = vadd.f32 %v840_v33, %v839_v30  ;;  %v842_v35 = vpop.f32.mrb[2].mxu1 }
 0x130   :  { %v843_v36 = vpop.f32.mrb[3].mxu1 }
 0x131   :  { %v553_v37 = vadd.f32 %v841_v34, %v513_v32 }
 0x135   :  { %v632_v38 = vpop.f32.mrb[4].mxu1 }
 0x136   :  { %v890_v39 = vpop.f32.mrb[5].mxu1 }
 0x137   :  { %v635_v40 = vpop.f32.mrb[6].mxu1 }
 0x138   :  { %v891_v41 = vpop.f32.mrb[7].mxu1 }
 0x14b   :  { %v861_v42 = vpop.f32.mrb[4].mxu0 }
 0x14c   :  { %v862_v43 = vpop.f32.mrb[5].mxu0 }
 0x14d   :  { %v863_v44 = vadd.f32 %v862_v43, %v861_v42  ;;  %v864_v45 = vpop.f32.mrb[6].mxu0 }
 0x14e   :  { %v865_v46 = vpop.f32.mrb[7].mxu0 }
 0x14f   :  { %v593_v47 = vadd.f32 %v863_v44, %v553_v37 }
 0x151   :  { %v633_v48 = vadd.f32 %v632_v38, %v593_v47 }
 0x153   :  { %v638_v49 = vmax.f32 %v633_v48, 0.0 }
 0x155   :  { %925 = vmatmul.mubr.f32.vlgmr.msra.gmra.mrb[8].mxu1 %v638_v49 }
 0x228   :  { %v728_v51 = vpop.f32.mrb[8].mxu1 }
 0x229   :  { %v729_v52 = vadd.f32 %v800_v50, %v728_v51  ;;  %v926_v53 = vpop.f32.mrb[9].mxu1 }
 0x22b   :  { %732 = vst [vmem:[#allocation8] sm:$0xff] %v729_v52 }
 0x22c   :  { %1088 = shalt.err (!%p1085_p0)
}
 0x22d   :  { %s1089_s13 = scalar_lea.hbm %s1207_s5, 128 }
 0x22e   :  { %p1090_p1 = scmp.ne.s32.totalorder %s1207_s5, %s1089_s13  ;;  %p1093_p2 = scmp.lt.u32.totalorder %s1089_s13, %s1207_s5 }
 0x230   :  { %p1095_p3 = pnand %p1093_p2, %p1090_p1 }
 0x232   :  { %1098 = shalt.err (!%p1095_p3)
}
 0x233   :  { %742 = dma.vmem_to_hbm [thread:$0]  %s740_s9, 128, %s1207_s5, [#allocation4]  }
 0x234   :  { %1103 = dma.done.wait [#allocation4], 128  }
 0x235   :  { %1104 = vsyncadd [#allocation4], 4294967168 }
 0x236   :  { %746 = vsyncpa [#allocation3], 1 }
 0x237   :  { %747 = vsyncpa [#allocation6], 1 }
 0x238   :  { %748 = vsyncpa [#allocation4], 1 }

</bundles_post_ra>
